<compile_context>
chip_gen: v7x
topology: tpu7x:2x2x1
jax: 0.10.0
libtpu: 0.0.40
codegen_flags: <defaults>
</compile_context>

<pallas_src>
import math
from typing import NamedTuple

import jax
import jax.numpy as jnp
from jax import lax
from jax.experimental import pallas as pl
from jax.experimental.pallas import tpu as pltpu


class AttentionParams(NamedTuple):
    wq: jax.Array    # (H, C, hd)  bf16, softmax scale folded in
    wk: jax.Array    # (H, C, hd)  bf16
    wv: jax.Array    # (H, C, hd)  bf16
    wo: jax.Array    # (H, hd, C)  bf16  (rows of W_proj^T grouped by head)
    bias: jax.Array  # (1, C)      f32


def prepare_attention_params(w_qkv, w_proj, b_proj, *, num_heads):
    """One-time parameter prep (outside the forward path): transpose, split per
    head, fold softmax scale into Wq, cast matmul operands to bf16."""
    _, C = w_qkv.shape
    hd = C // num_heads
    scale = hd ** (-0.5)

    w_qkv_t = w_qkv.T                       # (C, 3C); columns ordered (3, H, hd)

    def split_heads(cols):                  # (C, C) -> (H, C, hd)
        return cols.reshape(C, num_heads, hd).transpose(1, 0, 2)

    wq = split_heads(w_qkv_t[:, 0 * C:1 * C]) * scale   # fold scale into Wq
    wk = split_heads(w_qkv_t[:, 1 * C:2 * C])
    wv = split_heads(w_qkv_t[:, 2 * C:3 * C])
    wo = w_proj.T.reshape(num_heads, hd, C)              # (H, hd, C)

    return AttentionParams(
        wq=wq.astype(jnp.bfloat16),
        wk=wk.astype(jnp.bfloat16),
        wv=wv.astype(jnp.bfloat16),
        wo=wo.astype(jnp.bfloat16),
        bias=b_proj.reshape(1, C).astype(jnp.float32),
    )


def _attention_head_kernel(xq_ref, xkv_ref, wq_ref, wk_ref, wv_ref, wo_ref, b_ref,
                           o_ref, acc_ref):
    # Grid: (batch, query_tile, head); head is the reduction axis.
    h = pl.program_id(2)

    @pl.when(h == 0)
    def _init():
        acc_ref[...] = jnp.zeros_like(acc_ref)

    # Cast activations to bf16 in VMEM (MXU inputs); f32 accumulation everywhere.
    xq = xq_ref[...].astype(jnp.bfloat16)     # (TQ, C)  query-tile rows
    xkv = xkv_ref[...].astype(jnp.bfloat16)   # (N,  C)  full sequence for K/V

    # Per-head projections; softmax scale is pre-folded into wq.
    q = jnp.dot(xq, wq_ref[...], preferred_element_type=jnp.float32).astype(jnp.bfloat16)   # (TQ, hd)
    k = jnp.dot(xkv, wk_ref[...], preferred_element_type=jnp.float32).astype(jnp.bfloat16)  # (N, hd)
    v = jnp.dot(xkv, wv_ref[...], preferred_element_type=jnp.float32).astype(jnp.bfloat16)  # (N, hd)

    # Scores q @ k^T as an NT matmul (no transpose materialized), f32 accumulation.
    s = lax.dot_general(q, k, (((1,), (1,)), ((), ())),
                        preferred_element_type=jnp.float32)            # (TQ, N)

    # Softmax in f32; normalize AFTER the P@V matmul ((TQ, hd) multiplies instead
    # of (TQ, N)) with an EUP approximate reciprocal.
    s_max = jnp.max(s, axis=-1, keepdims=True)
    p = jnp.exp(s - s_max)
    denom = jnp.sum(p, axis=-1, keepdims=True)
    o_h = jnp.dot(p.astype(jnp.bfloat16), v, preferred_element_type=jnp.float32)  # (TQ, hd)
    o_h = o_h * pl.reciprocal(denom, approx=True)

    # Head's contribution to the output projection:
    #   out += o_h @ (W_proj^T)[h*hd:(h+1)*hd, :]
    # Accumulating per head replaces the old lane-axis concat with a lane-dense
    # (TQ, C) accumulator.
    acc_ref[...] += jnp.dot(o_h.astype(jnp.bfloat16), wo_ref[...],
                            preferred_element_type=jnp.float32)        # (TQ, C)

    @pl.when(h == pl.num_programs(2) - 1)
    def _finalize():
        o_ref[...] = (acc_ref[...] + b_ref[...]).astype(o_ref.dtype)


def attention_forward(x, params: AttentionParams, *, q_tile: int = 128):
    """x: (B, N, C) float32; params from prepare_attention_params. Returns (B, N, C)."""
    B, N, C = x.shape
    H, _, hd = params.wq.shape

    tq = min(q_tile, N)                 # 128-row query tiles (full N if shorter)
    n_q_tiles = pl.cdiv(N, tq)

    grid_spec = pltpu.PrefetchScalarGridSpec(
        num_scalar_prefetch=0,
        grid=(B, n_q_tiles, H),
        in_specs=[
            # x, query-tile view (changes per (b, t)):
            pl.BlockSpec((None, tq, C), lambda b, t, h: (b, t, 0)),
            # x, full-sequence view for K/V (constant across t and h -> fetched once per batch):
            pl.BlockSpec((None, N, C), lambda b, t, h: (b, 0, 0)),
            # Per-head weight slices streamed by DMA (no 2x-resident full weights in VMEM):
            pl.BlockSpec((None, C, hd), lambda b, t, h: (h, 0, 0)),    # Wq (scaled)
            pl.BlockSpec((None, C, hd), lambda b, t, h: (h, 0, 0)),    # Wk
            pl.BlockSpec((None, C, hd), lambda b, t, h: (h, 0, 0)),    # Wv
            pl.BlockSpec((None, hd, C), lambda b, t, h: (h, 0, 0)),    # W_proj rows for head h
            pl.BlockSpec((1, C), lambda b, t, h: (0, 0)),              # proj bias
        ],
        out_specs=pl.BlockSpec((None, tq, C), lambda b, t, h: (b, t, 0)),
        scratch_shapes=[pltpu.VMEM((tq, C), jnp.float32)],             # f32 accumulator
    )

    return pl.pallas_call(
        _attention_head_kernel,
        out_shape=jax.ShapeDtypeStruct((B, N, C), x.dtype),
        grid_spec=grid_spec,
        compiler_params=pltpu.CompilerParams(
            dimension_semantics=("parallel", "parallel", "arbitrary"),
            vmem_limit_bytes=32 * 1024 * 1024,
        ),
    )(x, x, params.wq, params.wk, params.wv, params.wo, params.bias)


def _reference(x, w_qkv, w_proj, b_proj, num_heads):
    """Pure-JAX (f32) mirror of the PyTorch forward pass."""
    B, N, C = x.shape
    hd = C // num_heads
    scale = hd ** (-0.5)
    qkv = x @ w_qkv.T
    qkv = qkv.reshape(B, N, 3, num_heads, hd).transpose(2, 0, 3, 1, 4)
    q, k, v = qkv[0], qkv[1], qkv[2]
    s = jnp.einsum("bhnd,bhmd->bhnm", q, k) * scale
    p = jax.nn.softmax(s, axis=-1)
    o = jnp.einsum("bhnm,bhmd->bhnd", p, v)
    o = o.transpose(0, 2, 1, 3).reshape(B, N, C)
    return o @ w_proj.T + b_proj


if __name__ == "__main__":
    B, N, C, H = 2, 8, 32, 8   # dim=32, num_heads=8 -> head_dim=4

    key = jax.random.PRNGKey(0)
    kx, kq, kp, kb = jax.random.split(key, 4)

    x = jax.random.normal(kx, (B, N, C), dtype=jnp.float32)
    w_qkv = jax.random.normal(kq, (3 * C, C), dtype=jnp.float32) * (1.0 / math.sqrt(C))
    w_proj = jax.random.normal(kp, (C, C), dtype=jnp.float32) * (1.0 / math.sqrt(C))
    b_proj = jax.random.normal(kb, (C,), dtype=jnp.float32) * 0.01

    params = prepare_attention_params(w_qkv, w_proj, b_proj, num_heads=H)

    out = attention_forward(x, params)
    out = jax.block_until_ready(out)

    ref = _reference(x, w_qkv, w_proj, b_proj, H)
    assert out.shape == (B, N, C)
    # bf16 MXU inputs (softmax/accumulation kept in f32) -> relaxed tolerance vs f32 ref.
    assert jnp.allclose(out, ref, atol=5e-2, rtol=5e-2), "mismatch vs pure-JAX reference"

    print("KERNEL_OK")
</pallas_src>

<mosaic_0001>
module attributes {stable_mosaic.version = 11 : i64} {
  func.func @_attention_head_kernel(%arg0: i32, %arg1: i32, %arg2: i32, %arg3: memref<1x8x32xf32, #tpu.memory_space<vmem>>, %arg4: memref<1x8x32xf32, #tpu.memory_space<vmem>>, %arg5: memref<1x32x4xbf16, #tpu.memory_space<vmem>>, %arg6: memref<1x32x4xbf16, #tpu.memory_space<vmem>>, %arg7: memref<1x32x4xbf16, #tpu.memory_space<vmem>>, %arg8: memref<1x4x32xbf16, #tpu.memory_space<vmem>>, %arg9: memref<1x32xf32, #tpu.memory_space<vmem>>, %arg10: memref<1x8x32xf32, #tpu.memory_space<vmem>>, %arg11: memref<8x32xf32, #tpu.memory_space<vmem>>) attributes {dimension_semantics = [#tpu.dimension_semantics<parallel>, #tpu.dimension_semantics<parallel>, #tpu.dimension_semantics<arbitrary>], iteration_bounds = array<i64: 2, 1, 8>, scalar_prefetch = 0 : i64, scratch_operands = 1 : i64, tpu.core_type = #tpu.core_type<tc>, window_params = [{transform_indices = @transform_0, window_bounds = array<i64: 1, 8, 32>}, {transform_indices = @transform_1, window_bounds = array<i64: 1, 8, 32>}, {transform_indices = @transform_2, window_bounds = array<i64: 1, 32, 4>}, {transform_indices = @transform_3, window_bounds = array<i64: 1, 32, 4>}, {transform_indices = @transform_4, window_bounds = array<i64: 1, 32, 4>}, {transform_indices = @transform_5, window_bounds = array<i64: 1, 4, 32>}, {pipeline_mode = #tpu.pipeline_mode<synchronous>, transform_indices = @transform_6, window_bounds = array<i64: 1, 32>}, {transform_indices = @transform_7, window_bounds = array<i64: 1, 8, 32>}]} {
    %c0_i32 = arith.constant 0 : i32
    %0 = arith.cmpi eq, %arg2, %c0_i32 : i32
    %1 = arith.extui %0 : i1 to i32
    %c0_i32_0 = arith.constant 0 : i32
    %2 = arith.cmpi ne, %1, %c0_i32_0 : i32
    scf.if %2 {
      %cst_30 = arith.constant 0.000000e+00 : f32
      %44 = vector.broadcast %cst_30 : f32 to vector<8x32xf32>
      %c0_31 = arith.constant 0 : index
      %c0_32 = arith.constant 0 : index
      %45 = vector.load %arg11[%c0_31, %c0_32] : memref<8x32xf32, #tpu.memory_space<vmem>>, vector<8x32xf32>
      tpu.vector_store %arg11[%c0_31, %c0_32], %44 {strides = array<i32>} : memref<8x32xf32, #tpu.memory_space<vmem>>, vector<8x32xf32>,
    } else {
    }
    %c0 = arith.constant 0 : index
    %c0_1 = arith.constant 0 : index
    %c0_2 = arith.constant 0 : index
    %3 = vector.load %arg3[%c0, %c0_1, %c0_2] : memref<1x8x32xf32, #tpu.memory_space<vmem>>, vector<1x8x32xf32>
    %4 = vector.shape_cast %3 : vector<1x8x32xf32> to vector<8x32xf32>
    %5 = arith.truncf %4 : vector<8x32xf32> to vector<8x32xbf16>
    %c0_3 = arith.constant 0 : index
    %c0_4 = arith.constant 0 : index
    %c0_5 = arith.constant 0 : index
    %6 = vector.load %arg4[%c0_3, %c0_4, %c0_5] : memref<1x8x32xf32, #tpu.memory_space<vmem>>, vector<1x8x32xf32>
    %7 = vector.shape_cast %6 : vector<1x8x32xf32> to vector<8x32xf32>
    %8 = arith.truncf %7 : vector<8x32xf32> to vector<8x32xbf16>
    %c0_6 = arith.constant 0 : index
    %c0_7 = arith.constant 0 : index
    %c0_8 = arith.constant 0 : index
    %9 = vector.load %arg5[%c0_6, %c0_7, %c0_8] : memref<1x32x4xbf16, #tpu.memory_space<vmem>>, vector<1x32x4xbf16>
    %10 = vector.shape_cast %9 : vector<1x32x4xbf16> to vector<32x4xbf16>
    %cst = arith.constant dense<0.000000e+00> : vector<8x4xf32>
    %11 = tpu.matmul %5, %10, %cst {dimension_numbers = #tpu.dot_dimension_numbers<[1], [0], [0], [1], [0, 0, 1, 1], [], []>} : vector<8x32xbf16>, vector<32x4xbf16>, vector<8x4xf32> -> vector<8x4xf32>
    %12 = arith.truncf %11 : vector<8x4xf32> to vector<8x4xbf16>
    %c0_9 = arith.constant 0 : index
    %c0_10 = arith.constant 0 : index
    %c0_11 = arith.constant 0 : index
    %13 = vector.load %arg6[%c0_9, %c0_10, %c0_11] : memref<1x32x4xbf16, #tpu.memory_space<vmem>>, vector<1x32x4xbf16>
    %14 = vector.shape_cast %13 : vector<1x32x4xbf16> to vector<32x4xbf16>
    %cst_12 = arith.constant dense<0.000000e+00> : vector<8x4xf32>
    %15 = tpu.matmul %8, %14, %cst_12 {dimension_numbers = #tpu.dot_dimension_numbers<[1], [0], [0], [1], [0, 0, 1, 1], [], []>} : vector<8x32xbf16>, vector<32x4xbf16>, vector<8x4xf32> -> vector<8x4xf32>
    %16 = arith.truncf %15 : vector<8x4xf32> to vector<8x4xbf16>
    %c0_13 = arith.constant 0 : index
    %c0_14 = arith.constant 0 : index
    %c0_15 = arith.constant 0 : index
    %17 = vector.load %arg7[%c0_13, %c0_14, %c0_15] : memref<1x32x4xbf16, #tpu.memory_space<vmem>>, vector<1x32x4xbf16>
    %18 = vector.shape_cast %17 : vector<1x32x4xbf16> to vector<32x4xbf16>
    %cst_16 = arith.constant dense<0.000000e+00> : vector<8x4xf32>
    %19 = tpu.matmul %8, %18, %cst_16 {dimension_numbers = #tpu.dot_dimension_numbers<[1], [0], [0], [1], [0, 0, 1, 1], [], []>} : vector<8x32xbf16>, vector<32x4xbf16>, vector<8x4xf32> -> vector<8x4xf32>
    %20 = arith.truncf %19 : vector<8x4xf32> to vector<8x4xbf16>
    %cst_17 = arith.constant dense<0.000000e+00> : vector<8x8xf32>
    %21 = tpu.matmul %12, %16, %cst_17 {dimension_numbers = #tpu.dot_dimension_numbers<[1], [1], [0], [0], [0, 0, 1, 0], [], []>} : vector<8x4xbf16>, vector<8x4xbf16>, vector<8x8xf32> -> vector<8x8xf32>
    %cst_18 = arith.constant dense<0xFF800000> : vector<8xf32>
    %22 = vector.multi_reduction <maximumf>, %21, %cst_18 [1] : vector<8x8xf32> to vector<8xf32>
    %23 = vector.shape_cast %22 : vector<8xf32> to vector<8x1xf32>
    %24 = vector.broadcast %23 : vector<8x1xf32> to vector<8x8xf32>
    %25 = arith.subf %21, %24 : vector<8x8xf32>
    %26 = math.exp %25 : vector<8x8xf32>
    %cst_19 = arith.constant dense<0.000000e+00> : vector<8xf32>
    %27 = vector.multi_reduction <add>, %26, %cst_19 [1] : vector<8x8xf32> to vector<8xf32>
    %28 = vector.shape_cast %27 : vector<8xf32> to vector<8x1xf32>
    %29 = arith.truncf %26 : vector<8x8xf32> to vector<8x8xbf16>
    %cst_20 = arith.constant dense<0.000000e+00> : vector<8x4xf32>
    %30 = tpu.matmul %29, %20, %cst_20 {dimension_numbers = #tpu.dot_dimension_numbers<[1], [0], [0], [1], [0, 0, 1, 1], [], []>} : vector<8x8xbf16>, vector<8x4xbf16>, vector<8x4xf32> -> vector<8x4xf32>
    %31 = tpu.reciprocal %28 {approx = true} : vector<8x1xf32> -> vector<8x1xf32>
    %32 = vector.broadcast %31 : vector<8x1xf32> to vector<8x4xf32>
    %33 = arith.mulf %30, %32 : vector<8x4xf32>
    %c0_21 = arith.constant 0 : index
    %c0_22 = arith.constant 0 : index
    %34 = vector.load %arg11[%c0_21, %c0_22] : memref<8x32xf32, #tpu.memory_space<vmem>>, vector<8x32xf32>
    %35 = arith.truncf %33 : vector<8x4xf32> to vector<8x4xbf16>
    %c0_23 = arith.constant 0 : index
    %c0_24 = arith.constant 0 : index
    %c0_25 = arith.constant 0 : index
    %36 = vector.load %arg8[%c0_23, %c0_24, %c0_25] : memref<1x4x32xbf16, #tpu.memory_space<vmem>>, vector<1x4x32xbf16>
    %37 = vector.shape_cast %36 : vector<1x4x32xbf16> to vector<4x32xbf16>
    %cst_26 = arith.constant dense<0.000000e+00> : vector<8x32xf32>
    %38 = tpu.matmul %35, %37, %cst_26 {dimension_numbers = #tpu.dot_dimension_numbers<[1], [0], [0], [1], [0, 0, 1, 1], [], []>} : vector<8x4xbf16>, vector<4x32xbf16>, vector<8x32xf32> -> vector<8x32xf32>
    %39 = arith.addf %34, %38 : vector<8x32xf32>
    %c0_27 = arith.constant 0 : index
    %c0_28 = arith.constant 0 : index
    %40 = vector.load %arg11[%c0_27, %c0_28] : memref<8x32xf32, #tpu.memory_space<vmem>>, vector<8x32xf32>
    tpu.vector_store %arg11[%c0_27, %c0_28], %39 {strides = array<i32>} : memref<8x32xf32, #tpu.memory_space<vmem>>, vector<8x32xf32>,
    %c7_i32 = arith.constant 7 : i32
    %41 = arith.cmpi eq, %arg2, %c7_i32 : i32
    %42 = arith.extui %41 : i1 to i32
    %c0_i32_29 = arith.constant 0 : i32
    %43 = arith.cmpi ne, %42, %c0_i32_29 : i32
    scf.if %43 {
      %c0_30 = arith.constant 0 : index
      %c0_31 = arith.constant 0 : index
      %44 = vector.load %arg11[%c0_30, %c0_31] : memref<8x32xf32, #tpu.memory_space<vmem>>, vector<8x32xf32>
      %c0_32 = arith.constant 0 : index
      %c0_33 = arith.constant 0 : index
      %45 = vector.load %arg9[%c0_32, %c0_33] : memref<1x32xf32, #tpu.memory_space<vmem>>, vector<1x32xf32>
      %46 = vector.broadcast %45 : vector<1x32xf32> to vector<8x32xf32>
      %47 = arith.addf %44, %46 : vector<8x32xf32>
      %c0_34 = arith.constant 0 : index
      %c0_35 = arith.constant 0 : index
      %c0_36 = arith.constant 0 : index
      %48 = vector.load %arg10[%c0_34, %c0_35, %c0_36] : memref<1x8x32xf32, #tpu.memory_space<vmem>>, vector<1x8x32xf32>
      %49 = vector.shape_cast %48 : vector<1x8x32xf32> to vector<8x32xf32>
      %50 = vector.shape_cast %47 : vector<8x32xf32> to vector<1x8x32xf32>
      tpu.vector_store %arg10[%c0_34, %c0_35, %c0_36], %50 {strides = array<i32>} : memref<1x8x32xf32, #tpu.memory_space<vmem>>, vector<1x8x32xf32>,
    } else {
    }
    return
  }
  func.func @transform_0(%arg0: i32, %arg1: i32, %arg2: i32) -> (i32, i32, i32) {
    %c0_i32 = arith.constant 0 : i32
    %c0_i32_0 = arith.constant 0 : i32
    return %arg0, %arg1, %c0_i32 : i32, i32, i32
  }
  func.func @transform_1(%arg0: i32, %arg1: i32, %arg2: i32) -> (i32, i32, i32) {
    %c0_i32 = arith.constant 0 : i32
    %c0_i32_0 = arith.constant 0 : i32
    %c0_i32_1 = arith.constant 0 : i32
    return %arg0, %c0_i32, %c0_i32_0 : i32, i32, i32
  }
  func.func @transform_2(%arg0: i32, %arg1: i32, %arg2: i32) -> (i32, i32, i32) {
    %c0_i32 = arith.constant 0 : i32
    %c0_i32_0 = arith.constant 0 : i32
    %c0_i32_1 = arith.constant 0 : i32
    return %arg2, %c0_i32, %c0_i32_0 : i32, i32, i32
  }
  func.func @transform_3(%arg0: i32, %arg1: i32, %arg2: i32) -> (i32, i32, i32) {
    %c0_i32 = arith.constant 0 : i32
    %c0_i32_0 = arith.constant 0 : i32
    %c0_i32_1 = arith.constant 0 : i32
    return %arg2, %c0_i32, %c0_i32_0 : i32, i32, i32
  }
  func.func @transform_4(%arg0: i32, %arg1: i32, %arg2: i32) -> (i32, i32, i32) {
    %c0_i32 = arith.constant 0 : i32
    %c0_i32_0 = arith.constant 0 : i32
    %c0_i32_1 = arith.constant 0 : i32
    return %arg2, %c0_i32, %c0_i32_0 : i32, i32, i32
  }
  func.func @transform_5(%arg0: i32, %arg1: i32, %arg2: i32) -> (i32, i32, i32) {
    %c0_i32 = arith.constant 0 : i32
    %c0_i32_0 = arith.constant 0 : i32
    %c0_i32_1 = arith.constant 0 : i32
    return %arg2, %c0_i32, %c0_i32_0 : i32, i32, i32
  }
  func.func @transform_6(%arg0: i32, %arg1: i32, %arg2: i32) -> (i32, i32) {
    %c0_i32 = arith.constant 0 : i32
    %c0_i32_0 = arith.constant 0 : i32
    %c0_i32_1 = arith.constant 0 : i32
    return %c0_i32, %c0_i32_0 : i32, i32
  }
  func.func @transform_7(%arg0: i32, %arg1: i32, %arg2: i32) -> (i32, i32, i32) {
    %c0_i32 = arith.constant 0 : i32
    %c0_i32_0 = arith.constant 0 : i32
    return %arg0, %arg1, %c0_i32 : i32, i32, i32
  }
}

</mosaic_0001>

<bundles_post_ra>
// kernel: tpu_custom_call.1
= control target key start
LH: loop header
LB: loop body
LE: loop exit
PB: predicated region body
PF: predicated region fallthrough
CT: control target
= control target key end

     0   :  { %s1415_s0 = inlined_call_operand.vmem [shape: f32[2,8,32], index: 0, kind: input, shape index: {}]   ;;  %s1416_s1 = inlined_call_operand.vmem [shape: f32[2,8,32], index: 1, kind: input, shape index: {}]   ;;  %s1417_s2 = inlined_call_operand.vmem [shape: bf16[8,32,4], index: 2, kind: input, shape index: {}]   ;;  %s1418_s3 = inlined_call_operand.vmem [shape: bf16[8,32,4], index: 3, kind: input, shape index: {}]   ;;  %s1419_s4 = inlined_call_operand.vmem [shape: bf16[8,32,4], index: 4, kind: input, shape index: {}]   ;;  %s1420_s5 = inlined_call_operand.vmem [shape: bf16[8,4,32], index: 5, kind: input, shape index: {}]   ;;  %s1421_s6 = inlined_call_operand.vmem [shape: f32[1,32], index: 6, kind: input, shape index: {}]   ;;  %s1422_s7 = inlined_call_operand.hbm [shape: f32[2,8,32], index: 7, kind: output, shape index: {}]  }
   0x1   :  { %1433 = sst [smem:[#allocation15_spill]] %s1422_s7 }
   0x2   :  { %12 = vsyncpa [#allocation4], 0 }
   0x3   :  { %14 = vsyncpa [#allocation4 + $0x1], 0  ;;  %s1232_s24 = smov 0   ;;  %s1234_s25 = smov 0  }
   0x4   :  { %s1236_s26 = smov 0   ;;  %s1238_s27 = smov 0  }
   0x5   :  { %s1240_s28 = smov 0   ;;  %s1242_s29 = smov 0  }
   0x6   :  { %s1244_s30 = smov 0   ;;  %s1246_s8 = smov 0  }
   0x7 LB: > { %1434 = sst [smem:[#allocation6_spill]] %s1158_s24  ;;  %s914_s9 = sadd.s32 4294967295, %s1186_s8   ;;  %s1186_s8 = sphi %s1246_s8, %s20_s8   ;;  %s1182_s30 = sphi %s1244_s30, %s1459_s30   ;;  %s1178_s29 = sphi %s1242_s29, %s1455_s29   ;;  %s1174_s28 = sphi %s1240_s28, %s1454_s28   ;;  %s1170_s27 = sphi %s1238_s27, %s1453_s27   ;;  %s1166_s26 = sphi %s1236_s26, %s1452_s26   ;;  %s1162_s25 = sphi %s1234_s25, %s1458_s25   ;;  %s1158_s24 = sphi %s1232_s24, %s1457_s24  }
   0x8   : > { %1435 = sst [smem:[#allocation7_spill]] %s1166_s26  ;;  %s915_s10 = sadd.s32 4294967294, %s1186_s8  }
   0x9   : > { %1436 = sst [smem:[#allocation8_spill]] %s1178_s29  ;;  %s32_s11 = sadd.s32 1, %s1178_s29 }
   0xa   : > { %1437 = sst [smem:[#allocation9_spill]] %s1182_s30  ;;  %p33_p0 = scmp.ge.s32.totalorder %s32_s11, 8 }
   0xb   : > { %1438 = sst [smem:[#allocation10_spill]] %s1186_s8  ;;  %s39_s12 = sadd.s32 1, %s1182_s30 }
   0xc   : > { %p237_p1 = scmp.ne.s32.totalorder %s1166_s26, %s1162_s25  ;;  %p238_p2 = scmp.eq.s32.totalorder %s914_s9, 15 }
   0xd   : > { %s1461_s11 = smov (%p33_p0, %s32_s11), 0  ;;  %s1463_s12 = smov (!%p33_p0, %s39_s12), %s1182_s30 }
   0xe   : > { %1439 = sst [smem:[#allocation11_spill]] %s1461_s11  ;;  %p1281_p3 = por %p238_p2, %p237_p1 }
   0xf   : > { %p243_p4 = scmp.ne.s32.totalorder %s1162_s25, %s1158_s24  ;;  %p41_p5 = scmp.ge.s32.totalorder %s1463_s12, 2 }
  0x10   : > { %p244_p6 = scmp.eq.s32.totalorder %s915_s10, 15  ;;  %p918_p7 = scmp.ge.s32.totalorder %s1186_s8, 1 }
  0x11   : > { %p313_p8 = scmp.lt.s32.totalorder %s1186_s8, 17  ;;  %s1465_s12 = smov (%p41_p5, %s1463_s12), 0 }
  0x12   : > { %1441 = sst [smem:[#allocation12_spill]] %s1465_s12  ;;  %p1291_p9 = por %p244_p6, %p243_p4 }
  0x13   : > { %p314_p10 = pnand %p918_p7, %p313_p8  ;;  %s222_s15 = ssub.s32 %s1182_s30, %s1465_s12 }
  0x14   : > { %s1442_s14 = scalar_select %p1291_p9, 1, 0 }
  0x15   : > { %s227_s16 = sadd.s32 1, %s1166_s26  ;;  %p225_p11 = scmp.eq.s32.totalorder %s222_s15, 0 }
  0x16   : > { %1443 = sst [smem:[#allocation13_spill]] %s1442_s14  ;;  %317 = sbr.rel (%p314_p10) target bundleno = 1109 (0x455), region = 48 }
  0x17   : > { %s1299_s17 = scalar_select %p225_p11, %s1166_s26, %s227_s16  }
  0x18   : > { %s1426_s18 = sand.u32 (!%p314_p10), 1, %s1162_s25   ;;  %p370_p12 = scmp.lt.s32.totalorder (!%p314_p10), %s1174_s28, 1 }
  0x19   : > { %1444 = sst [smem:[#allocation14_spill]] %s1299_s17  ;;  %s1305_s19 = sshll.u32 (!%p314_p10), %s1426_s18, 3 }
  0x1a   : > { %p381_p13 = scmp.lt.s32.totalorder (!%p314_p10), %s1170_s27, 7  ;;  %p929_p0 = scmp.ne.s32.totalorder (!%p314_p10), %s1170_s27, 0 }
  0x1d   : > { %s371_s20 = scalar_select %p370_p12, %s1174_s28, 1 }
  0x1e   : > { %s382_s21 = scalar_select %p381_p13, %s1170_s27, 7 }
  0x1f   : > { %s920_s22 = sshll.u32 %s371_s20, 3  ;;  %404 = sbr.rel (%p929_p0) target bundleno = 38 (0x26), region = 52  ;;  %vm405_vm0 = vcmask (!%p929_p0), 261120   ;;  %v1188_v0 = vmov (!%p929_p0), 0.0  }
  0x20   : > { %s376_s10 = scalar_lea.vmem %s1415_s0, %s920_s22  ;;  %s380_s12 = scalar_lea.vmem %s1416_s1, %s920_s22  ;;  %406 = vst.msk [vmem:[#allocation2] sm:$0xff] (!%p929_p0), %vm405_vm0, %v1188_v0 }
  0x21   : > { %s948_s11 = sshll.u32 %s382_s21, 4  ;;  %s928_s30 = sshll.u32 %s382_s21, 1 }
  0x22   : > { %s385_s18 = scalar_lea.vmem %s1417_s2, %s948_s11  ;;  %s390_s24 = scalar_lea.vmem %s1418_s3, %s948_s11 }
  0x23   : > { %s1325_s7 = scalar_lea.vmem %s1419_s4, %s948_s11  ;;  %s1330_s15 = scalar_lea.vmem %s1420_s5, %s928_s30 }
  0x24   : > { %s369_s22 = scalar_lea.vmem [#allocation3], %s1305_s19 }
  0x26 PF: > { %v1082_v1 = vld [vmem:[%s390_s24] sm:$0xff]   ;;  %v1189_v2 = vmov 0.0   ;;  %v1083_v3 = vld [vmem:[%s390_s24 + $0x8] sm:$0xff]   ;;  %vm1190_vm1 = vmmov 0   ;;  %vm427_vm2 = vcmask 261120   ;;  %vm589_vm3 = vcmask 31744  }
  0x27   : > { %974 = vmatprep.subr.bf16.mxu1 %v1189_v2  ;;  %966 = vmatprep.subr.bf16.mxu0 %v1189_v2  ;;  %v1084_v4 = vld [vmem:[%s385_s18] sm:$0xff]   ;;  %v1085_v6 = vld [vmem:[%s385_s18 + $0x8] sm:$0xff]   ;;  %vm636_vm4 = vcmask 64512   ;;  %vm650_vm5 = vcmask 1043456   ;;  %vm702_vm6 = vcmask 1041408   ;;  %p942_p1 = scmp.ne.s32.totalorder %s1170_s27, 7 }
  0x28   : > { %975 = vmatpush3.bf16.msra.mxu1 %v1082_v1  ;;  %978 = vmatprep.mubr.msk.bf16.mxu1 %vm1190_vm1, %v1189_v2  ;;  %v409_v5 = vld [vmem:[%s380_s12] sm:$0xff]  ;;  %v1087_v11 = vld [vmem:[%s1325_s7 + $0x8] sm:$0xff]  }
  0x29   : > { %976 = vmatprep.subr.bf16.mxu1 %v1189_v2  ;;  %970 = vmatprep.mubr.msk.bf16.mxu0 %vm1190_vm1, %v1189_v2  ;;  %v407_v7 = vld [vmem:[%s376_s10] sm:$0xff]  ;;  %v410_v8 = vpack.c.bf16 %v409_v5, %v409_v5 }
  0x2a   : > { %967 = vmatpush3.bf16.msra.mxu0 %v1084_v4  ;;  %v408_v9 = vpack.c.bf16 %v407_v7, %v407_v7  ;;  %v1086_v10 = vld [vmem:[%s1325_s7] sm:$0xff]  }
  0x2b   : > { %968 = vmatprep.subr.bf16.mxu0 %v1189_v2  ;;  %v698_v40 = vld [vmem:[%s1330_s15] sm:$0x3] }
  0x2c   : > { %977 = vmatpush3.bf16.msra.mxu1 %v1083_v3  ;;  %v704_v41 = vsel %vm702_vm6, %v698_v40, 0  ;;  %v696_v50 = vld [vmem:[#allocation2] sm:$0xff] }
  0x2d   : > { %990 = vmatprep.subr.bf16.mxu1 %v1189_v2  ;;  %v943_v57 = vld [vmem:[%s1421_s6] ss:$0 sm:$0xff] (!%p942_p1) }
  0x2e   : > { %969 = vmatpush3.bf16.msra.mxu0 %v1085_v6 }
  0x2f   : > { %979 = vmatmul.mubr.msk.bf16.vlgmr.msra.gmra.mrb[0].mxu1 %vm427_vm2, %v410_v8  ;;  %982 = vmatprep.subr.bf16.mxu0 %v1189_v2 }
  0x30   : > { %992 = vmatprep.mubr.msk.bf16.mxu1 %vm1190_vm1, %v1189_v2 }
  0x31   : > { %971 = vmatmul.mubr.msk.bf16.vlgmr.msra.gmra.mrb[0].mxu0 %vm427_vm2, %v408_v9 }
  0x32   : > { %986 = vmatprep.mubr.msk.bf16.mxu0 %vm1190_vm1, %v1189_v2  ;;  %983 = vmatpush3.bf16.msra.mxu0 %v1086_v10 }
  0x33   : > { %984 = vmatprep.subr.bf16.mxu0 %v1189_v2 }
  0x36   : > { %985 = vmatpush3.bf16.msra.mxu0 %v1087_v11 }
  0x37   : > { %996 = vmatprep.subr.bf16.mxu0 %v1189_v2 }
  0x39   : > { %987 = vmatmul.mubr.msk.bf16.vlgmr.msra.gmra.mrb[4].mxu0 %vm427_vm2, %v410_v8 }
  0x3a   : > { %998 = vmatprep.mubr.msk.bf16.mxu0 %vm1190_vm1, %v1189_v2 }
 0x102   : > { %v525_v12 = vpop.f32.mrb[0].mxu1 }
 0x103   : > { %v531_v13 = vpack.c.bf16 %v525_v12, %v525_v12  ;;  %v980_v14 = vpop.f32.mrb[1].mxu1 }
 0x104   : > { %v528_v15 = vpop.f32.mrb[2].mxu1  ;;  %v465_v16 = vpop.f32.mrb[0].mxu0 }
 0x105   : > { %v594_v17 = vsel %vm589_vm3, %v531_v13, 0  ;;  %v981_v18 = vpop.f32.mrb[3].mxu1  ;;  %v972_v19 = vpop.f32.mrb[1].mxu0  ;;  %v471_v22 = vpack.c.bf16 %v465_v16, %v465_v16 }
 0x106   : > { %991 = vmatpush3.bf16.xpose.msra.mxu1 %v594_v17  ;;  %v468_v20 = vpop.f32.mrb[2].mxu0 }
 0x107   : > { %v973_v21 = vpop.f32.mrb[3].mxu0  ;;  %1002 = vmatprep.subr.bf16.mxu1 %v1189_v2 }
 0x10c   : > { %v582_v28 = vpop.f32.mrb[4].mxu0 }
 0x10d   : > { %993 = vmatmul.mubr.msk.bf16.vlgmr.msra.gmra.mrb[4].mxu1 %vm589_vm3, %v471_v22  ;;  %v588_v29 = vpack.c.bf16 %v582_v28, %v582_v28  ;;  %v988_v30 = vpop.f32.mrb[5].mxu0 }
 0x10e   : > { %1004 = vmatprep.mubr.msk.bf16.mxu1 %vm1190_vm1, %v1189_v2  ;;  %v585_v31 = vpop.f32.mrb[6].mxu0  ;;  %1003 = vmatpush3.bf16.msra.mxu1 %v704_v41 }
 0x10f   : > { %v652_v32 = vsel %vm650_vm5, %v588_v29, 0  ;;  %v989_v33 = vpop.f32.mrb[7].mxu0 }
 0x110   : > { %997 = vmatpush3.bf16.msra.mxu0 %v652_v32 }
 0x1e0   : > { %v630_v23 = vpop.f32.mrb[4].mxu1 }
 0x1e1   : > { %v994_v24 = vpop.f32.mrb[5].mxu1  ;;  %v637_v25 = vsel %vm636_vm4, %v630_v23, -inf }
 0x1e2   : > { %638 = vmax.xlane.f32.xlu0 %v637_v25  ;;  %v633_v26 = vpop.f32.mrb[6].mxu1 }
 0x1e3   : > { %v995_v27 = vpop.f32.mrb[7].mxu1 }
 0x26f   : > { %v639_v34 = vpop.xlane.xlu0 %638 }
 0x270   : > { %v640_v35 = vsub.f32 %v630_v23, %v639_v34 }
 0x272   : > { %v641_v36 = vmul.f32 1.442695, %v640_v35 }
 0x274   : > { %1088 = vpow2.f32 %v641_v36 }
 0x27e   : > { %v1089_v37 = vpop.eup %1088 }
 0x27f   : > { %v643_v38 = vsel %vm636_vm4, %v1089_v37, 0.0  ;;  %v646_v39 = vpack.c.bf16 %v1089_v37, %v1089_v37 }
 0x280   : > { %644 = vadd.xlane.f32.xlu0 %v643_v38 }
 0x281   : > { %999 = vmatmul.mubr.msk.bf16.vlgmr.msra.gmra.mrb[8].mxu0 %vm636_vm4, %v646_v39 }
 0x30d   : > { %v645_v42 = vpop.xlane.xlu0 %644 }
 0x30e   : > { %1090 = vrcp.f32 %v645_v42 }
 0x318   : > { %v1091_v43 = vpop.eup %1090 }
 0x354   : > { %v688_v44 = vpop.f32.mrb[8].mxu0 }
 0x355   : > { %v695_v45 = vmul.f32 %v1091_v43, %v688_v44  ;;  %v1000_v46 = vpop.f32.mrb[9].mxu0 }
 0x356   : > { %v691_v47 = vpop.f32.mrb[10].mxu0 }
 0x357   : > { %v697_v48 = vpack.c.bf16 %v695_v45, %v695_v45  ;;  %v1001_v49 = vpop.f32.mrb[11].mxu0 }
 0x359   : > { %1005 = vmatmul.mubr.msk.bf16.vlgmr.msra.gmra.mrb[8].mxu1 %vm589_vm3, %v697_v48 }
 0x429   : > { %751 = sbr.rel (%p942_p1) target bundleno = 1082 (0x43a), region = 56 }
 0x42c   : > { %v740_v51 = vpop.f32.mrb[8].mxu1 }
 0x42d   : > { %v746_v52 = vadd.f32 %v740_v51, %v696_v50  ;;  %v1006_v53 = vpop.f32.mrb[9].mxu1 }
 0x42e   : > { %v743_v54 = vpop.f32.mrb[10].mxu1 }
 0x42f   : > { %747 = vst.msk [vmem:[#allocation2] sm:$0xff] %vm427_vm2, %v746_v52  ;;  %v1007_v55 = vpop.f32.mrb[11].mxu1 }
 0x436   : > { %v752_v56 = vld [vmem:[#allocation2] sm:$0xff] }
 0x437   : > { %v760_v58 = vadd.f32 %v943_v57, %v752_v56 }
 0x439   : > { %761 = vst.msk [vmem:[%s369_s22] sm:$0xff] %vm427_vm2, %v760_v58 }
 0x43a PF: > { %s945_s26 = sshll.u32 %s1174_s28, 7  ;;  %s1445_s27 = sld [smem:[#allocation15_spill]] }
 0x43b   : > { %s777_s12 = sshll.u32 %s369_s22, 4  ;;  %s1447_s14 = sand.u32 1, %s1162_s25   ;;  %s778_s12 = int_to_ptr.vmem [resolvable:$true] %s777_s12 }
 0x43c   : > { %s763_s17 = scalar_lea.sflag [#allocation4], %s1447_s14  ;;  %s1092_s18 = scalar_lea.vmem %s778_s12, 128 }
 0x43d   : > { %p1093_p2 = scmp.ne.s32.totalorder %s778_s12, %s1092_s18  ;;  %s1191_s21 = smov [#allocation3]  }
 0x43e   : > { %s1096_s10 = sshll.u32 %s1191_s21, 4  ;;  %s1097_s10 = int_to_ptr.vmem [resolvable:$false] %s1096_s10 }
 0x43f   : > { %p1094_p4 = pnand %p1093_p2, %p1281_p3  ;;  %s1098_s16 = scalar_lea.vmem %s1097_s10, 256 }
 0x440   : > { %s1446_s11 = smov %s1445_s27  ;;  %s1364_s8 = scalar_lea.hbm %s1445_s27, %s945_s26 }
 0x441   : > { %p1095_p5 = pneg %p1094_p4  ;;  %p1099_p6 = scmp.lt.s32.totalorder %s778_s12, %s1097_s10 }
 0x442   : > { %p1100_p7 = scmp.lt.s32.totalorder %s1098_s16, %s1092_s18 }
 0x444   : > { %p1101_p8 = por %p1100_p7, %p1099_p6 }
 0x446   : > { %p1102_p10 = pnand %p1101_p8, %p1095_p5 }
 0x448   : > { %1105 = shalt.err (!%p1102_p10)
}
 0x449   : > { %s1106_s28 = scalar_lea.hbm %s1364_s8, 128  ;;  %s1110_s23 = scalar_lea.hbm %s1446_s11, 256 }
 0x44a   : > { %p1107_p11 = scmp.ne.s32.totalorder %s1364_s8, %s1106_s28  ;;  %p1111_p0 = scmp.lt.u32.totalorder %s1364_s8, %s1446_s11 }
 0x44b   : > { %p1112_p1 = scmp.lt.u32.totalorder %s1110_s23, %s1106_s28  ;;  %p1114_p4 = scmp.lt.u32.totalorder %s1106_s28, %s1364_s8 }
 0x44c   : > { %p1108_p12 = pnand %p1107_p11, %p1281_p3 }
 0x44d   : > { %p1113_p2 = por %p1112_p1, %p1111_p0 }
 0x44e   : > { %p1109_p13 = pneg %p1108_p12 }
 0x44f   : > { %p1115_p5 = por %p1114_p4, %p1113_p2 }
 0x451   : > { %p1116_p6 = pnand %p1115_p5, %p1109_p13 }
 0x453   : > { %1119 = shalt.err (!%p1116_p6)
}
 0x454   : > { %1008 = dma.vmem_to_hbm [thread:$0]  (%p1281_p3), %s778_s12, 128, %s1364_s8, %s763_s17  }
 0x455 PF: > { %s1448_s22 = sld [smem:[#allocation10_spill]]  ;;  %s1449_s7 = sld [smem:[#allocation6_spill]] }
 0x45b   : > { %p1014_p7 = scmp.ge.s32.totalorder %s1448_s22, 2  ;;  %s789_s26 = sand.u32 1, %s1449_s7  }
 0x45c   : > { %s790_s29 = scalar_lea.sflag [#allocation4], %s789_s26 }
 0x45d   : > { %p1011_p8 = pnand %p1014_p7, %p1291_p9 }
 0x45f   : > { %1153 = dma.done.wait (!%p1011_p8), %s790_s29, 128  }
 0x460   : > { %1155 = vsyncadd (!%p1011_p8), %s790_s29, 4294967168  ;;  %s20_s8 = sadd.s32 1, %s1448_s22   ;;  %s1451_s30 = sld [smem:[#allocation7_spill]] }
 0x461   : > { %p17_p10 = scmp.ge.s32.totalorder %s20_s8, 18   ;;  %s1452_s26 = sld [smem:[#allocation14_spill]] }
 0x462   : > { %s1453_s27 = sld [smem:[#allocation8_spill]]  ;;  %s1454_s28 = sld [smem:[#allocation9_spill]] }
 0x463   : > { %s1455_s29 = sld [smem:[#allocation11_spill]]  ;;  %s1456_s13 = sld [smem:[#allocation12_spill]] }
 0x464   : > { %s1457_s24 = smov %s1162_s25  ;;  %19 = sbr.rel (!%p17_p10) target bundleno = 7 (0x7), region = 106 }
 0x466   : > { %s1458_s25 = smov %s1451_s30 }
 0x469   : > { %s1459_s30 = smov %s1456_s13 }
 0x46b   :  { %795 = vsyncpa [#allocation4], 1 }
 0x46c   :  { %797 = vsyncpa [#allocation4 + $0x1], 1 }

</bundles_post_ra>
